<compile_context>
chip_gen: v7x
topology: tpu7x:2x2x1
jax: 0.10.0
libtpu: 0.0.40
codegen_flags: <defaults>
</compile_context>

<pallas_src>
import functools

import jax
import jax.numpy as jnp
from jax.experimental import pallas as pl
from jax.experimental.pallas import tpu as pltpu


_ROW_ALIGN = 16  # sublane tile safe for both f32 (8) and bf16 (16) blocks


def _round_up(x, m):
    return ((x + m - 1) // m) * m


def _align_tile_m(tile_m, n, *, max_tile_m=None):
    """Clamp / align a row tile; a full-extent block (tile_m == n) is always legal."""
    tile_m = max(1, min(int(tile_m), n))
    if max_tile_m is not None:
        tile_m = min(tile_m, max_tile_m)
    if tile_m >= n:
        return n
    tile_m = _round_up(tile_m, _ROW_ALIGN)
    return n if tile_m >= n else tile_m


def _choose_tile_m(n, *, max_tile_m=1024, min_steps=4):
    """~N/min_steps rows per step (keeps >=2 balanced steps for v7x's 2 TCs),
    capped at max_tile_m, aligned to the sublane tile."""
    return _align_tile_m(pl.cdiv(n, min_steps), n, max_tile_m=max_tile_m)


def _time_encoding_concat_kernel(u_ref, t_ref, wuT_ref, wt_ref, b_ref, o_ref):
    # u_ref   : (TM, F)  row tile of node embeddings, native input dtype
    # t_ref   : (TM, 1)  row tile of timestamps, f32
    # wuT_ref : (F,  O)  fc1.weight[:, :F].T in compute dtype (grid-invariant)
    # wt_ref  : (1,  O)  fc1.weight[:,  F]  (time column), f32 (grid-invariant)
    # b_ref   : (1,  O)  fc1.bias, f32 (grid-invariant)
    # o_ref   : (TM, O)
    u = u_ref[...].astype(wuT_ref.dtype)                # in-kernel cast (VPU, hidden under DMA)
    acc = jnp.dot(u, wuT_ref[...],
                  preferred_element_type=jnp.float32)   # MXU, f32 accumulate
    acc = acc + t_ref[...] * wt_ref[...] + b_ref[...]   # f32 epilogue (VPU)
    o_ref[...] = jnp.maximum(acc, 0.0).astype(o_ref.dtype)


def prepare_concat_params(weight, bias, *, compute_dtype=jnp.float32):
    """Split fc1 params once (hoistable when weights are static).

    weight: (O, F+1) in PyTorch nn.Linear layout, bias: (O,).
    Returns (wuT (F,O) in compute_dtype, wt_row (1,O) f32, b_row (1,O) f32).
    """
    o, fp1 = weight.shape
    f = fp1 - 1
    wuT = jnp.asarray(weight[:, :f].T, dtype=compute_dtype)        # (F, O)
    wt_row = jnp.asarray(weight[:, f], dtype=jnp.float32)[None]    # (1, O)
    b_row = jnp.asarray(bias, dtype=jnp.float32)[None]             # (1, O)
    return wuT, wt_row, b_row


def time_encoding_layer_concat_prepared(u, t, wuT, wt_row, b_row, *,
                                        tile_m=None, out_dtype=None):
    """relu(u @ wuT + t * wt_row + b_row) with pre-prepared parameters."""
    n, f = u.shape
    assert wuT.shape[0] == f
    o = wuT.shape[1]
    out_dtype = u.dtype if out_dtype is None else jnp.dtype(out_dtype)

    tile_m = (_choose_tile_m(n) if tile_m is None
              else _align_tile_m(tile_m, n))
    grid_m = pl.cdiv(n, tile_m)

    # Timestamps stay f32 everywhere (precision-safe); (N,1) reshape is metadata.
    t_col = t.reshape(n, 1).astype(jnp.float32)

    # VMEM budget from the actual tiles: double-buffered row tiles +
    # single-buffered invariant weights; capped below v7x's 64 MiB/TC.
    in_isz = jnp.dtype(u.dtype).itemsize
    cmp_isz = jnp.dtype(wuT.dtype).itemsize
    out_isz = jnp.dtype(out_dtype).itemsize
    vmem_bytes = (2 * (tile_m * f * in_isz       # u tile
                       + tile_m * 4              # t tile
                       + tile_m * o * out_isz)   # out tile
                  + f * o * cmp_isz              # weight (single-buffered)
                  + 2 * o * 4)                   # time col + bias rows
    vmem_limit = int(min(max(vmem_bytes + (4 << 20), 16 << 20), 48 << 20))

    return pl.pallas_call(
        _time_encoding_concat_kernel,
        out_shape=jax.ShapeDtypeStruct((n, o), out_dtype),
        grid_spec=pltpu.PrefetchScalarGridSpec(
            num_scalar_prefetch=0,
            grid=(grid_m,),
            in_specs=[
                pl.BlockSpec((tile_m, f), lambda i: (i, 0)),
                pl.BlockSpec((tile_m, 1), lambda i: (i, 0)),
                pl.BlockSpec((f, o), lambda i: (0, 0),
                             pipeline_mode=pl.Buffered(1)),
                pl.BlockSpec((1, o), lambda i: (0, 0),
                             pipeline_mode=pl.Buffered(1)),
                pl.BlockSpec((1, o), lambda i: (0, 0),
                             pipeline_mode=pl.Buffered(1)),
            ],
            out_specs=pl.BlockSpec((tile_m, o), lambda i: (i, 0)),
        ),
        compiler_params=pltpu.CompilerParams(
            dimension_semantics=("parallel",),
            vmem_limit_bytes=vmem_limit),
    )(u, t_col, wuT, wt_row, b_row)


def time_encoding_layer_concat(u, t, weight, bias, *, tile_m=None,
                               compute_dtype=jnp.float32, out_dtype=None):
    """relu([u, t] @ weight.T + bias) with weight: (O, F+1), bias: (O,)."""
    n, f = u.shape
    o = weight.shape[0]
    assert weight.shape == (o, f + 1)
    wuT, wt_row, b_row = prepare_concat_params(
        weight, bias, compute_dtype=compute_dtype)
    return time_encoding_layer_concat_prepared(
        u, t, wuT, wt_row, b_row, tile_m=tile_m, out_dtype=out_dtype)


def _reference(u, t, weight, bias):
    x = jnp.concatenate([u, t.reshape(-1, 1).astype(u.dtype)], axis=1)
    return jnp.maximum(x @ weight.T + bias, 0.0)


if __name__ == "__main__":
    in_features = 32
    out_features = 32
    n = 512   # -> tile_m=128, 4 balanced "parallel" grid steps

    key = jax.random.PRNGKey(0)
    k_u, k_t, k_w, k_b = jax.random.split(key, 4)

    u = jax.random.normal(k_u, (n, in_features), dtype=jnp.float32)
    t = jax.random.uniform(k_t, (n,), dtype=jnp.float32)

    # fc1.weight: xavier_normal_ on shape (out_features, in_features + 1)
    fan_in, fan_out = in_features + 1, out_features
    xavier_std = (2.0 / (fan_in + fan_out)) ** 0.5
    weight = xavier_std * jax.random.normal(
        k_w, (out_features, in_features + 1), dtype=jnp.float32)
    # fc1.bias: default Linear init U(-1/sqrt(fan_in), 1/sqrt(fan_in))
    bound = 1.0 / (fan_in ** 0.5)
    bias = jax.random.uniform(
        k_b, (out_features,), dtype=jnp.float32, minval=-bound, maxval=bound)

    ref = _reference(u, t, weight, bias)

    # Default exact f32 path (matches torch numerics).
    fwd = jax.jit(time_encoding_layer_concat)
    out = jax.block_until_ready(fwd(u, t, weight, bias))
    assert out.shape == (n, out_features) and out.dtype == u.dtype
    assert jnp.allclose(out, ref, atol=1e-4, rtol=1e-4)

    # Opt-in bf16 matmul + bf16 output fast path (f32 accumulate + f32 epilogue).
    fwd_bf16 = jax.jit(functools.partial(time_encoding_layer_concat,
                                         compute_dtype=jnp.bfloat16,
                                         out_dtype=jnp.bfloat16))
    out_b = jax.block_until_ready(fwd_bf16(u, t, weight, bias))
    assert out_b.shape == (n, out_features) and out_b.dtype == jnp.bfloat16
    assert jnp.allclose(out_b.astype(jnp.float32), ref, atol=1e-1, rtol=1e-1)

    # Ragged N (partial final block, no wrapper-side padding).
    n2 = 200
    out_r = jax.block_until_ready(
        time_encoding_layer_concat(u[:n2], t[:n2], weight, bias))
    assert out_r.shape == (n2, out_features)
    assert jnp.allclose(out_r, ref[:n2], atol=1e-4, rtol=1e-4)

    # Pre-prepared params entry point (weight prep hoisted out of the call path).
    wuT, wt_row, b_row = prepare_concat_params(weight, bias)
    out_p = jax.block_until_ready(jax.jit(time_encoding_layer_concat_prepared)(
        u, t, wuT, wt_row, b_row))
    assert out_p.shape == (n, out_features)
    assert jnp.allclose(out_p, ref, atol=1e-4, rtol=1e-4)

    print("KERNEL_OK")
</pallas_src>

<mosaic_0001>
module attributes {stable_mosaic.version = 11 : i64} {
  func.func @_time_encoding_concat_kernel(%arg0: i32, %arg1: memref<128x32xf32, #tpu.memory_space<vmem>>, %arg2: memref<128x1xf32, #tpu.memory_space<vmem>>, %arg3: memref<32x32xf32, #tpu.memory_space<vmem>>, %arg4: memref<1x32xf32, #tpu.memory_space<vmem>>, %arg5: memref<1x32xf32, #tpu.memory_space<vmem>>, %arg6: memref<128x32xf32, #tpu.memory_space<vmem>>) attributes {dimension_semantics = [#tpu.dimension_semantics<parallel>], iteration_bounds = array<i64: 4>, scalar_prefetch = 0 : i64, scratch_operands = 0 : i64, tpu.core_type = #tpu.core_type<tc>, window_params = [{transform_indices = @transform_0, window_bounds = array<i64: 128, 32>}, {transform_indices = @transform_1, window_bounds = array<i64: 128, 1>}, {pipeline_mode = #tpu.pipeline_mode<synchronous>, transform_indices = @transform_2, window_bounds = array<i64: 32, 32>}, {pipeline_mode = #tpu.pipeline_mode<synchronous>, transform_indices = @transform_3, window_bounds = array<i64: 1, 32>}, {pipeline_mode = #tpu.pipeline_mode<synchronous>, transform_indices = @transform_4, window_bounds = array<i64: 1, 32>}, {transform_indices = @transform_5, window_bounds = array<i64: 128, 32>}]} {
    %c0 = arith.constant 0 : index
    %c0_0 = arith.constant 0 : index
    %0 = vector.load %arg1[%c0, %c0_0] : memref<128x32xf32, #tpu.memory_space<vmem>>, vector<128x32xf32>
    %c0_1 = arith.constant 0 : index
    %c0_2 = arith.constant 0 : index
    %1 = vector.load %arg3[%c0_1, %c0_2] : memref<32x32xf32, #tpu.memory_space<vmem>>, vector<32x32xf32>
    %cst = arith.constant dense<0.000000e+00> : vector<128x32xf32>
    %2 = tpu.matmul %0, %1, %cst {dimension_numbers = #tpu.dot_dimension_numbers<[1], [0], [0], [1], [0, 0, 1, 1], [], []>} : vector<128x32xf32>, vector<32x32xf32>, vector<128x32xf32> -> vector<128x32xf32>
    %c0_3 = arith.constant 0 : index
    %c0_4 = arith.constant 0 : index
    %3 = vector.load %arg2[%c0_3, %c0_4] : memref<128x1xf32, #tpu.memory_space<vmem>>, vector<128x1xf32>
    %c0_5 = arith.constant 0 : index
    %c0_6 = arith.constant 0 : index
    %4 = vector.load %arg4[%c0_5, %c0_6] : memref<1x32xf32, #tpu.memory_space<vmem>>, vector<1x32xf32>
    %5 = vector.broadcast %3 : vector<128x1xf32> to vector<128x32xf32>
    %6 = vector.broadcast %4 : vector<1x32xf32> to vector<128x32xf32>
    %7 = arith.mulf %5, %6 : vector<128x32xf32>
    %8 = arith.addf %2, %7 : vector<128x32xf32>
    %c0_7 = arith.constant 0 : index
    %c0_8 = arith.constant 0 : index
    %9 = vector.load %arg5[%c0_7, %c0_8] : memref<1x32xf32, #tpu.memory_space<vmem>>, vector<1x32xf32>
    %10 = vector.broadcast %9 : vector<1x32xf32> to vector<128x32xf32>
    %11 = arith.addf %8, %10 : vector<128x32xf32>
    %cst_9 = arith.constant 0.000000e+00 : f32
    %12 = vector.broadcast %cst_9 : f32 to vector<128x32xf32>
    %13 = arith.maximumf %11, %12 : vector<128x32xf32>
    %c0_10 = arith.constant 0 : index
    %c0_11 = arith.constant 0 : index
    %14 = vector.load %arg6[%c0_10, %c0_11] : memref<128x32xf32, #tpu.memory_space<vmem>>, vector<128x32xf32>
    tpu.vector_store %arg6[%c0_10, %c0_11], %13 {strides = array<i32>} : memref<128x32xf32, #tpu.memory_space<vmem>>, vector<128x32xf32>,
    return
  }
  func.func @transform_0(%arg0: i32) -> (i32, i32) {
    %c0_i32 = arith.constant 0 : i32
    %c0_i32_0 = arith.constant 0 : i32
    return %arg0, %c0_i32 : i32, i32
  }
  func.func @transform_1(%arg0: i32) -> (i32, i32) {
    %c0_i32 = arith.constant 0 : i32
    %c0_i32_0 = arith.constant 0 : i32
    return %arg0, %c0_i32 : i32, i32
  }
  func.func @transform_2(%arg0: i32) -> (i32, i32) {
    %c0_i32 = arith.constant 0 : i32
    %c0_i32_0 = arith.constant 0 : i32
    %c0_i32_1 = arith.constant 0 : i32
    return %c0_i32, %c0_i32_0 : i32, i32
  }
  func.func @transform_3(%arg0: i32) -> (i32, i32) {
    %c0_i32 = arith.constant 0 : i32
    %c0_i32_0 = arith.constant 0 : i32
    %c0_i32_1 = arith.constant 0 : i32
    return %c0_i32, %c0_i32_0 : i32, i32
  }
  func.func @transform_4(%arg0: i32) -> (i32, i32) {
    %c0_i32 = arith.constant 0 : i32
    %c0_i32_0 = arith.constant 0 : i32
    %c0_i32_1 = arith.constant 0 : i32
    return %c0_i32, %c0_i32_0 : i32, i32
  }
  func.func @transform_5(%arg0: i32) -> (i32, i32) {
    %c0_i32 = arith.constant 0 : i32
    %c0_i32_0 = arith.constant 0 : i32
    return %arg0, %c0_i32 : i32, i32
  }
}

</mosaic_0001>

<bundles_post_ra>
// kernel: time_encoding_layer_concat.1
= control target key start
LH: loop header
LB: loop body
LE: loop exit
PB: predicated region body
PF: predicated region fallthrough
CT: control target
= control target key end

     0   :  { %s851_s18 = smov 0   ;;  %s1022_s0 = inlined_call_operand.vmem [shape: f32[512,32], index: 0, kind: input, shape index: {}]   ;;  %s1023_s1 = inlined_call_operand.vmem [shape: f32[512,1], index: 1, kind: input, shape index: {}]   ;;  %s1024_s2 = inlined_call_operand.vmem [shape: f32[32,32], index: 2, kind: input, shape index: {}]   ;;  %s1025_s3 = inlined_call_operand.vmem [shape: f32[1,32], index: 3, kind: input, shape index: {}]   ;;  %s1026_s4 = inlined_call_operand.vmem [shape: f32[1,32], index: 4, kind: input, shape index: {}]   ;;  %s1027_s5 = inlined_call_operand.vmem [shape: f32[512,32], index: 5, kind: output, shape index: {}]  }
   0x1 LB: > { %s706_s19 = sadd.s32 4294967295, %s818_s18   ;;  %p710_p0 = scmp.ge.s32.totalorder %s818_s18, 1  ;;  %s818_s18 = sphi %s851_s18, %s15_s18  }
   0x2   : > { %p199_p1 = scmp.lt.s32.totalorder %s818_s18, 5 }
   0x4   : > { %p200_p2 = pnand %p710_p0, %p199_p1 }
   0x5   : > { %v266_v0 = vld [vmem:[%s1024_s2] sm:$0xff] (!%p200_p2)  ;;  %v267_v1 = vld [vmem:[%s1024_s2 + $0x8] sm:$0xff] (!%p200_p2)  ;;  %v268_v2 = vld [vmem:[%s1024_s2 + $0x10] sm:$0xff] (!%p200_p2)  ;;  %s711_s26 = sshll.u32 (!%p200_p2), %s706_s19, 4  ;;  %v820_v5 = vmov (!%p200_p2), 0   ;;  %vm389_vm0 = vcmask (!%p200_p2), 261120  }
   0x6   : > { %203 = sbr.rel (%p200_p2) target bundleno = 251 (0xfb), region = 40  ;;  %v789_v3 = vpack.c.bf16 (!%p200_p2), %v267_v1, %v266_v0  ;;  %v269_v4 = vld [vmem:[%s1024_s2 + $0x18] sm:$0xff] (!%p200_p2)  ;;  %p233_p3 = scmp.lt.s32.totalorder (!%p200_p2), %s711_s26, 63  ;;  %811 = vset.pattern.permute.xlu1 (!%p200_p2), %v820_v5  ;;  %810 = vset.pattern.permute.xlu0 (!%p200_p2), %v820_v5  ;;  %v940_v51 = vld [vmem:[%s1025_s3] ss:$0 sm:$0xff] (!%p200_p2) }
   0x7   : > { %v793_v6 = vpack.c.bf16 (!%p200_p2), %v269_v4, %v268_v2  ;;  %v949_v59 = vld [vmem:[%s1026_s4] ss:$0 sm:$0xff] (!%p200_p2) }
   0x8   : > { %790 = vmatprep.subr.bf16.mxu0 (!%p200_p2), %v789_v3  ;;  %797 = vmatprep.subr.bf16.mxu1 (!%p200_p2), %v789_v3 }
   0x9   : > { %792 = vmatpush3.bf16.msra.mxu0 (!%p200_p2), %v789_v3  ;;  %799 = vmatpush3.bf16.msra.mxu1 (!%p200_p2), %v789_v3 }
   0xa   : > { %794 = vmatprep.subr.bf16.mxu0 (!%p200_p2), %v793_v6  ;;  %798 = vmatprep.subr.bf16.mxu1 (!%p200_p2), %v793_v6 }
   0xd   : > { %s1029_s26 = smov (!%p233_p3, %s711_s26), 63  ;;  %796 = vmatpush3.bf16.msra.mxu0 %v793_v6  ;;  %800 = vmatpush3.bf16.msra.mxu1 %v793_v6 }
   0xe   : > { %s871_s29 = sshll.u32 %s1029_s26, 3 }
   0xf   : > { %s877_s7 = scalar_lea.vmem %s1022_s0, %s871_s29  ;;  %s891_s10 = scalar_lea.vmem %s1023_s1, %s871_s29 }
  0x10   : > { %v250_v7 = vld [vmem:[%s877_s7] sm:$0xff]  ;;  %v251_v9 = vld [vmem:[%s877_s7 + $0x8] sm:$0xff]  ;;  %v252_v11 = vld [vmem:[%s877_s7 + $0x10] sm:$0xff]  ;;  %s959_s17 = scalar_lea.vmem %s1027_s5, %s871_s29 }
  0x11   : > { %v258_v8 = vld [vmem:[%s877_s7 + $0x40] sm:$0xff]  ;;  %v259_v10 = vld [vmem:[%s877_s7 + $0x48] sm:$0xff]  ;;  %765 = vmatprep.mubr.msk.f32.mxu0 %vm389_vm0, %v250_v7  ;;  %v260_v12 = vld [vmem:[%s877_s7 + $0x50] sm:$0xff] }
  0x12   : > { %777 = vmatprep.mubr.msk.f32.mxu1 %vm389_vm0, %v258_v8  ;;  %766 = vmatmul.mubr.msk.f32.vlgmr.msra.gmra.mrb[0].mxu0 %vm389_vm0, %v251_v9  ;;  %v253_v13 = vld [vmem:[%s877_s7 + $0x18] sm:$0xff]  ;;  %v272_v15 = vld [vmem:[%s891_s10 + $0x10] sm:$0xff]  ;;  %v270_v16 = vld [vmem:[%s891_s10] sm:$0xff] }
  0x13   : > { %778 = vmatmul.mubr.msk.f32.vlgmr.msra.gmra.mrb[0].mxu1 %vm389_vm0, %v259_v10  ;;  %768 = vmatprep.mubr.msk.f32.mxu0 %vm389_vm0, %v252_v11  ;;  %v261_v14 = vld [vmem:[%s877_s7 + $0x58] sm:$0xff]  ;;  %v254_v17 = vld [vmem:[%s877_s7 + $0x20] sm:$0xff]  ;;  %v271_v20 = vld [vmem:[%s891_s10 + $0x8] sm:$0xff] }
  0x14   : > { %780 = vmatprep.mubr.msk.f32.mxu1 %vm389_vm0, %v260_v12  ;;  %v262_v18 = vld [vmem:[%s877_s7 + $0x60] sm:$0xff]  ;;  %299 = vperm.xlu1 %811, %v272_v15   ;;  %v273_v19 = vld [vmem:[%s891_s10 + $0x18] sm:$0xff]  ;;  %v255_v21 = vld [vmem:[%s877_s7 + $0x28] sm:$0xff] }
  0x15   : > { %289 = vperm.xlu0 %810, %v270_v16   ;;  %v263_v22 = vld [vmem:[%s877_s7 + $0x68] sm:$0xff]  ;;  %v256_v23 = vld [vmem:[%s877_s7 + $0x30] sm:$0xff]  ;;  %v274_v26 = vld [vmem:[%s891_s10 + $0x20] sm:$0xff] }
  0x16   : > { %769 = vmatmul.mubr.msk.f32.gmra.mrb[2].mxu0 %vm389_vm0, %v253_v13  ;;  %v264_v24 = vld [vmem:[%s877_s7 + $0x70] sm:$0xff]  ;;  %v275_v25 = vld [vmem:[%s891_s10 + $0x28] sm:$0xff]  ;;  %v257_v27 = vld [vmem:[%s877_s7 + $0x38] sm:$0xff] }
  0x17   : > { %781 = vmatmul.mubr.msk.f32.gmra.mrb[2].mxu1 %vm389_vm0, %v261_v14  ;;  %771 = vmatprep.mubr.msk.f32.mxu0 %vm389_vm0, %v254_v17  ;;  %v265_v28 = vld [vmem:[%s877_s7 + $0x78] sm:$0xff]  ;;  %v276_v30 = vld [vmem:[%s891_s10 + $0x30] sm:$0xff]  ;;  %v279_v31 = vld [vmem:[%s891_s10 + $0x48] sm:$0xff] }
  0x18   : > { %783 = vmatprep.mubr.msk.f32.mxu1 %vm389_vm0, %v262_v18  ;;  %304 = vperm.xlu1 %811, %v273_v19   ;;  %v277_v29 = vld [vmem:[%s891_s10 + $0x38] sm:$0xff]  ;;  %v278_v32 = vld [vmem:[%s891_s10 + $0x40] sm:$0xff]  ;;  %v280_v34 = vld [vmem:[%s891_s10 + $0x50] sm:$0xff] }
  0x19   : > { %294 = vperm.xlu0 %810, %v271_v20   ;;  %v281_v33 = vld [vmem:[%s891_s10 + $0x58] sm:$0xff]  ;;  %v283_v35 = vld [vmem:[%s891_s10 + $0x68] sm:$0xff]  ;;  %v282_v36 = vld [vmem:[%s891_s10 + $0x60] sm:$0xff] }
  0x1a   : > { %772 = vmatmul.mubr.msk.f32.gmra.mrb[4].mxu0 %vm389_vm0, %v255_v21  ;;  %v285_v37 = vld [vmem:[%s891_s10 + $0x78] sm:$0xff]  ;;  %v284_v38 = vld [vmem:[%s891_s10 + $0x70] sm:$0xff] }
  0x1b   : > { %784 = vmatmul.mubr.msk.f32.gmra.mrb[4].mxu1 %vm389_vm0, %v263_v22  ;;  %774 = vmatprep.mubr.msk.f32.mxu0 %vm389_vm0, %v256_v23 }
  0x1c   : > { %786 = vmatprep.mubr.msk.f32.mxu1 %vm389_vm0, %v264_v24  ;;  %314 = vperm.xlu1 %811, %v275_v25  }
  0x1d   : > { %309 = vperm.xlu0 %810, %v274_v26  }
  0x1e   : > { %775 = vmatmul.mubr.msk.f32.gmra.mrb[6].mxu0 %vm389_vm0, %v257_v27 }
  0x1f   : > { %787 = vmatmul.mubr.msk.f32.gmra.mrb[6].mxu1 %vm389_vm0, %v265_v28 }
  0x20   : > { %324 = vperm.xlu1 %811, %v277_v29  }
  0x21   : > { %319 = vperm.xlu0 %810, %v276_v30  }
  0x24   : > { %334 = vperm.xlu1 %811, %v279_v31  }
  0x25   : > { %329 = vperm.xlu0 %810, %v278_v32  }
  0x28   : > { %344 = vperm.xlu1 %811, %v281_v33  }
  0x29   : > { %339 = vperm.xlu0 %810, %v280_v34  }
  0x2c   : > { %354 = vperm.xlu1 %811, %v283_v35  }
  0x2d   : > { %349 = vperm.xlu0 %810, %v282_v36  }
  0x30   : > { %364 = vperm.xlu1 %811, %v285_v37  }
  0x31   : > { %359 = vperm.xlu0 %810, %v284_v38  }
  0x93   : > { %v300_v39 = vpop.permute.xlu1 %299 }
  0x94   : > { %v290_v40 = vpop.permute.xlu0 %289  ;;  %v375_v7 = vmul.f32 %v940_v51, %v300_v39 }
  0x95   : > { %v373_v56 = vmul.f32 %v940_v51, %v290_v40 }
  0x97   : > { %v305_v41 = vpop.permute.xlu1 %304 }
  0x98   : > { %v295_v42 = vpop.permute.xlu0 %294  ;;  %v376_v3 = vmul.f32 %v940_v51, %v305_v41 }
  0x99   : > { %v374_v52 = vmul.f32 %v940_v51, %v295_v42 }
  0x9b   : > { %v315_v43 = vpop.permute.xlu1 %314 }
  0x9c   : > { %v310_v44 = vpop.permute.xlu0 %309  ;;  %v378_v23 = vmul.f32 %v940_v51, %v315_v43 }
  0x9d   : > { %v377_v29 = vmul.f32 %v940_v51, %v310_v44 }
  0x9f   : > { %v933_v45 = vpop.permute.xlu1 %324 }
  0xa0   : > { %v935_v46 = vpop.permute.xlu0 %319 }
  0xa3   : > { %v335_v47 = vpop.permute.xlu1 %334 }
  0xa4   : > { %v330_v48 = vpop.permute.xlu0 %329  ;;  %v382_v53 = vmul.f32 %v940_v51, %v335_v47  ;;  %v380_v47 = vmul.f32 %v940_v51, %v933_v45 }
  0xa5   : > { %v381_v57 = vmul.f32 %v940_v51, %v330_v48 }
  0xa7   : > { %v345_v49 = vpop.permute.xlu1 %344 }
  0xa8   : > { %v340_v50 = vpop.permute.xlu0 %339  ;;  %v384_v4 = vmul.f32 %v940_v51, %v345_v49 }
  0xa9   : > { %v383_v8 = vmul.f32 %v940_v51, %v340_v50 }
  0xab   : > { %v355_v54 = vpop.permute.xlu1 %354 }
  0xac   : > { %v350_v55 = vpop.permute.xlu0 %349  ;;  %v386_v24 = vmul.f32 %v940_v51, %v355_v54 }
  0xad   : > { %v385_v30 = vmul.f32 %v940_v51, %v350_v55 }
  0xaf   : > { %v365_v25 = vpop.permute.xlu1 %364 }
  0xb0   : > { %v360_v26 = vpop.permute.xlu0 %359  ;;  %v388_v48 = vmul.f32 %v940_v51, %v365_v25 }
  0xe5   : > { %v767_v58 = vpop.f32.mrb[0].mxu0 }
  0xe6   : > { %v779_v60 = vpop.f32.mrb[0].mxu1  ;;  %v510_v61 = vadd.f32 %v767_v58, %v374_v52  ;;  %v504_v63 = vpop.f32.mrb[1].mxu0  ;;  %v379_v52 = vmul.f32 %v940_v51, %v935_v46 }
  0xe7   : > { %v550_v62 = vadd.f32 %v779_v60, %v382_v53  ;;  %v544_v0 = vpop.f32.mrb[1].mxu1  ;;  %v505_v1 = vadd.f32 %v504_v63, %v373_v56  ;;  %v387_v53 = vmul.f32 %v940_v51, %v360_v26 }
  0xe8   : > { %v545_v2 = vadd.f32 %v544_v0, %v381_v57  ;;  %v591_v5 = vadd.f32 %v949_v59, %v510_v61 }
  0xe9   : > { %v599_v6 = vadd.f32 %v949_v59, %v550_v62  ;;  %v590_v9 = vadd.f32 %v949_v59, %v505_v1  ;;  %v770_v11 = vpop.f32.mrb[2].mxu0 }
  0xea   : > { %v598_v10 = vadd.f32 %v949_v59, %v545_v2  ;;  %v782_v12 = vpop.f32.mrb[2].mxu1  ;;  %v607_v13 = vmax.f32 %v591_v5, 0.0  ;;  %v520_v15 = vadd.f32 %v770_v11, %v376_v3  ;;  %v514_v17 = vpop.f32.mrb[3].mxu0 }
  0xeb   : > { %v615_v14 = vmax.f32 %v599_v6, 0.0  ;;  %v560_v16 = vadd.f32 %v782_v12, %v384_v4  ;;  %v554_v18 = vpop.f32.mrb[3].mxu1  ;;  %v606_v19 = vmax.f32 %v590_v9, 0.0  ;;  %v515_v21 = vadd.f32 %v514_v17, %v375_v7 }
  0xec   : > { %v614_v20 = vmax.f32 %v598_v10, 0.0  ;;  %v555_v22 = vadd.f32 %v554_v18, %v383_v8  ;;  %623 = vst.msk [vmem:[%s959_s17 + $0x8] sm:$0xff] %vm389_vm0, %v607_v13  ;;  %v593_v27 = vadd.f32 %v949_v59, %v520_v15 }
  0xed   : > { %631 = vst.msk [vmem:[%s959_s17 + $0x48] sm:$0xff] %vm389_vm0, %v615_v14  ;;  %v601_v28 = vadd.f32 %v949_v59, %v560_v16  ;;  %622 = vst.msk [vmem:[%s959_s17] sm:$0xff] %vm389_vm0, %v606_v19  ;;  %v592_v31 = vadd.f32 %v949_v59, %v515_v21  ;;  %v773_v33 = vpop.f32.mrb[4].mxu0 }
  0xee   : > { %630 = vst.msk [vmem:[%s959_s17 + $0x40] sm:$0xff] %vm389_vm0, %v614_v20  ;;  %v600_v32 = vadd.f32 %v949_v59, %v555_v22  ;;  %v785_v34 = vpop.f32.mrb[4].mxu1  ;;  %v609_v35 = vmax.f32 %v593_v27, 0.0  ;;  %v530_v37 = vadd.f32 %v773_v33, %v378_v23  ;;  %v524_v39 = vpop.f32.mrb[5].mxu0 }
  0xef   : > { %v617_v36 = vmax.f32 %v601_v28, 0.0  ;;  %v570_v38 = vadd.f32 %v785_v34, %v386_v24  ;;  %v564_v40 = vpop.f32.mrb[5].mxu1  ;;  %v608_v41 = vmax.f32 %v592_v31, 0.0  ;;  %v525_v43 = vadd.f32 %v524_v39, %v377_v29 }
  0xf0   : > { %v616_v42 = vmax.f32 %v600_v32, 0.0  ;;  %v565_v44 = vadd.f32 %v564_v40, %v385_v30  ;;  %625 = vst.msk [vmem:[%s959_s17 + $0x18] sm:$0xff] %vm389_vm0, %v609_v35  ;;  %v595_v49 = vadd.f32 %v949_v59, %v530_v37 }
  0xf1   : > { %633 = vst.msk [vmem:[%s959_s17 + $0x58] sm:$0xff] %vm389_vm0, %v617_v36  ;;  %v603_v50 = vadd.f32 %v949_v59, %v570_v38  ;;  %624 = vst.msk [vmem:[%s959_s17 + $0x10] sm:$0xff] %vm389_vm0, %v608_v41  ;;  %v594_v45 = vadd.f32 %v949_v59, %v525_v43  ;;  %v776_v55 = vpop.f32.mrb[6].mxu0 }
  0xf2   : > { %632 = vst.msk [vmem:[%s959_s17 + $0x50] sm:$0xff] %vm389_vm0, %v616_v42  ;;  %v602_v54 = vadd.f32 %v949_v59, %v565_v44  ;;  %v788_v56 = vpop.f32.mrb[6].mxu1  ;;  %v611_v57 = vmax.f32 %v595_v49, 0.0  ;;  %v540_v60 = vadd.f32 %v776_v55, %v380_v47  ;;  %v534_v61 = vpop.f32.mrb[7].mxu0 }
  0xf3   : > { %v619_v58 = vmax.f32 %v603_v50, 0.0  ;;  %v580_v46 = vadd.f32 %v788_v56, %v388_v48  ;;  %v574_v51 = vpop.f32.mrb[7].mxu1  ;;  %v610_v62 = vmax.f32 %v594_v45, 0.0  ;;  %v535_v0 = vadd.f32 %v534_v61, %v379_v52 }
  0xf4   : > { %v618_v63 = vmax.f32 %v602_v54, 0.0  ;;  %v575_v1 = vadd.f32 %v574_v51, %v387_v53  ;;  %627 = vst.msk [vmem:[%s959_s17 + $0x28] sm:$0xff] %vm389_vm0, %v611_v57  ;;  %v597_v2 = vadd.f32 %v949_v59, %v540_v60 }
  0xf5   : > { %635 = vst.msk [vmem:[%s959_s17 + $0x68] sm:$0xff] %vm389_vm0, %v619_v58  ;;  %v605_v3 = vadd.f32 %v949_v59, %v580_v46  ;;  %626 = vst.msk [vmem:[%s959_s17 + $0x20] sm:$0xff] %vm389_vm0, %v610_v62  ;;  %v596_v4 = vadd.f32 %v949_v59, %v535_v0 }
  0xf6   : > { %634 = vst.msk [vmem:[%s959_s17 + $0x60] sm:$0xff] %vm389_vm0, %v618_v63  ;;  %v604_v5 = vadd.f32 %v949_v59, %v575_v1  ;;  %v613_v6 = vmax.f32 %v597_v2, 0.0 }
  0xf7   : > { %v621_v7 = vmax.f32 %v605_v3, 0.0  ;;  %v612_v8 = vmax.f32 %v596_v4, 0.0 }
  0xf8   : > { %v620_v9 = vmax.f32 %v604_v5, 0.0  ;;  %629 = vst.msk [vmem:[%s959_s17 + $0x38] sm:$0xff] %vm389_vm0, %v613_v6 }
  0xf9   : > { %637 = vst.msk [vmem:[%s959_s17 + $0x78] sm:$0xff] %vm389_vm0, %v621_v7  ;;  %628 = vst.msk [vmem:[%s959_s17 + $0x30] sm:$0xff] %vm389_vm0, %v612_v8 }
  0xfa   : > { %636 = vst.msk [vmem:[%s959_s17 + $0x70] sm:$0xff] %vm389_vm0, %v620_v9 }
  0xfb PF: > { %s15_s18 = sadd.s32 1, %s818_s18  }
  0xfc   : > { %p12_p4 = scmp.ge.s32.totalorder %s15_s18, 6  }
  0xfe   :  { %14 = sbr.rel (!%p12_p4) target bundleno = 1 (0x1), region = 73 }

</bundles_post_ra>
